<compile_context>
chip_gen: v5e
topology: v5e:2x2
jax: 0.10.0
libtpu: 0.0.40
codegen_flags: <defaults>
</compile_context>

<pallas_src>
import jax
import jax.numpy as jnp
from jax.experimental import pallas as pl
from jax.experimental.pallas import tpu as pltpu

EPS = 1e-5


# --------------------------------------------------------------------------------------
# Kernels
# --------------------------------------------------------------------------------------
def _stats_kernel(x_ref, sums_ref):
    """Accumulate per-channel sum and sum-of-squares for one (half, b-tile, hw-tile) slab.

    x_ref:    (bs_t, C, hw_t) tile of the current half
    sums_ref: (1, 2, C) resident accumulator block for the current half
              [:, 0, :] = sum(x), [:, 1, :] = sum(x*x)
    """
    b = pl.program_id(1)
    h = pl.program_id(2)

    @pl.when((b == 0) & (h == 0))
    def _init():
        sums_ref[...] = jnp.zeros_like(sums_ref)

    x = x_ref[...].astype(jnp.float32)              # stats always accumulated in f32
    c = x.shape[1]
    s1 = jnp.sum(x, axis=(0, 2)).reshape(1, 1, c)   # single pass: sum
    s2 = jnp.sum(x * x, axis=(0, 2)).reshape(1, 1, c)  # and sum of squares
    # TODO(synk): for very large-mean activations a shifted/compensated sumsq would be
    # more robust than raw E[x^2]-E[x]^2; plain f32 accumulation is used here.
    sums_ref[:, 0:1, :] = sums_ref[:, 0:1, :] + s1
    sums_ref[:, 1:2, :] = sums_ref[:, 1:2, :] + s2


def _normalize_kernel(scale_ref, shift_ref, x_ref, o_ref):
    """out = x * scale + shift  (affine folded into per-channel scale/shift)."""
    x = x_ref[...]                                   # (bs_t, C, hw_t), input dtype
    scale = scale_ref[...].astype(x.dtype)           # (1, C, 1)
    shift = shift_ref[...].astype(x.dtype)           # (1, C, 1)
    o_ref[...] = (x * scale + shift).astype(o_ref.dtype)


# --------------------------------------------------------------------------------------
# Tiling helpers
# --------------------------------------------------------------------------------------
def _tpu_vmem_bytes(default=64 * 1024 * 1024):
    try:
        info = pltpu.get_tpu_info()
        return int(getattr(info, "vmem_capacity_bytes", default))
    except Exception:
        return default


def _largest_divisor_tile(total, max_tile, quantum):
    """Largest multiple of `quantum` that divides `total` and is <= max_tile.

    Falls back to `total` (full extent, always a legal block) if no such divisor exists.
    """
    if total <= max_tile:
        return total
    t = (max_tile // quantum) * quantum
    while t >= quantum:
        if total % t == 0:
            return t
        t -= quantum
    return total


# --------------------------------------------------------------------------------------
# Wrapper
# --------------------------------------------------------------------------------------
def transnorm_forward(x, weight, bias, *, eps=EPS):
    """TransNorm training forward: per-half (source/target) batch norm, concatenated."""
    N, C, H, W = x.shape
    assert N % 2 == 0, "TransNorm training forward expects an even batch (source+target)"
    bs = N // 2
    hw = H * W
    itemsize = jnp.dtype(x.dtype).itemsize
    xf = x.reshape(N, C, hw)  # hw (multiple of 128 for real conv shapes) stays the lane axis

    # --- per-generation tile sizing (v7x has 64 MiB VMEM, v5e/v6e 128 MiB) ------------
    vmem = _tpu_vmem_bytes()
    target_tile_bytes = max(512 * 1024, min(4 * 1024 * 1024, vmem // 16))

    max_hw_elems = max(128, target_tile_bytes // max(1, C * itemsize))
    hw_t = _largest_divisor_tile(hw, max_hw_elems, 128)      # lane-dense tiles (>=128)
    row_bytes = C * hw_t * itemsize
    bs_t = _largest_divisor_tile(bs, max(1, target_tile_bytes // max(1, row_bytes)), 1)
    n_b = bs // bs_t
    n_h = hw // hw_t

    tile_bytes = bs_t * C * hw_t * itemsize
    # in + out double-buffered (+ f32 staging in the stats pass) with headroom
    vmem_limit = int(min(0.75 * vmem, max(32 * 1024 * 1024, 8 * tile_bytes)))

    # --- phase 1: per-channel sum / sumsq per half -------------------------------------
    stats = pl.pallas_call(
        _stats_kernel,
        out_shape=jax.ShapeDtypeStruct((2, 2, C), jnp.float32),
        grid_spec=pltpu.PrefetchScalarGridSpec(
            num_scalar_prefetch=0,
            grid=(2, n_b, n_h),  # (half, batch-tile, hw-tile); tile axes are the reduction
            in_specs=[
                pl.BlockSpec((bs_t, C, hw_t), lambda i, b, h: (i * n_b + b, 0, h)),
            ],
            out_specs=pl.BlockSpec((1, 2, C), lambda i, b, h: (i, 0, 0)),
        ),
        compiler_params=pltpu.CompilerParams(
            dimension_semantics=("parallel", "arbitrary", "arbitrary"),
            vmem_limit_bytes=vmem_limit,
        ),
    )(xf)

    # --- fold batch stats + affine into per-channel scale/shift (tiny, C elements) -----
    cnt = jnp.float32(bs * hw)
    sum_x = stats[:, 0, :]                                   # (2, C)
    sum_x2 = stats[:, 1, :]                                  # (2, C)
    mean = sum_x / cnt
    var = jnp.maximum(sum_x2 / cnt - mean * mean, 0.0)       # biased variance (training)
    inv = jax.lax.rsqrt(var + jnp.float32(eps))
    w = weight.reshape(1, C).astype(jnp.float32)
    b = bias.reshape(1, C).astype(jnp.float32)
    scale = (inv * w).reshape(2, C, 1)
    shift = (b - mean * inv * w).reshape(2, C, 1)

    # --- phase 2: normalize + affine, fully parallel tiles ------------------------------
    out = pl.pallas_call(
        _normalize_kernel,
        out_shape=jax.ShapeDtypeStruct((N, C, hw), x.dtype),
        grid_spec=pltpu.PrefetchScalarGridSpec(
            num_scalar_prefetch=0,
            grid=(2, n_b, n_h),
            in_specs=[
                pl.BlockSpec((1, C, 1), lambda i, b, h: (i, 0, 0)),   # scale (per half)
                pl.BlockSpec((1, C, 1), lambda i, b, h: (i, 0, 0)),   # shift (per half)
                pl.BlockSpec((bs_t, C, hw_t), lambda i, b, h: (i * n_b + b, 0, h)),
            ],
            out_specs=pl.BlockSpec((bs_t, C, hw_t), lambda i, b, h: (i * n_b + b, 0, h)),
        ),
        compiler_params=pltpu.CompilerParams(
            dimension_semantics=("parallel", "parallel", "parallel"),
            vmem_limit_bytes=vmem_limit,
        ),
    )(scale, shift, xf)

    # TODO(synk): the reference forward() is truncated after z_source/z_target; the
    # running_mean/var buffer updates (unbiased var, momentum) and the adaptive-alpha
    # channel re-weighting are not shown in the snippet and are not implemented here.
    return out.reshape(N, C, H, W)


# --------------------------------------------------------------------------------------
# Pure-JAX reference (mirrors F.batch_norm training path on each half)
# --------------------------------------------------------------------------------------
def _reference(x, weight, bias):
    N = x.shape[0]
    bs = N // 2

    def bn(xh):
        m = xh.mean(axis=(0, 2, 3), keepdims=True)
        v = jnp.mean(jnp.square(xh - m), axis=(0, 2, 3), keepdims=True)
        return (xh - m) / jnp.sqrt(v + EPS) * weight.reshape(1, -1, 1, 1) + bias.reshape(
            1, -1, 1, 1
        )

    return jnp.concatenate([bn(x[:bs]), bn(x[bs:])], axis=0)


if __name__ == "__main__":
    key = jax.random.PRNGKey(0)
    kx, kw = jax.random.split(key)

    N, C, H, W = 4, 4, 16, 16  # N = 2 * batch_size (source + target halves)
    x = jax.random.normal(kx, (N, C, H, W), dtype=jnp.float32)

    # Parameters as in __init__/reset_parameters: weight ~ U[0,1), bias = 0.
    weight = jax.random.uniform(kw, (C,), dtype=jnp.float32)
    bias = jnp.zeros((C,), dtype=jnp.float32)

    fwd = jax.jit(transnorm_forward)
    out = fwd(x, weight, bias)
    out = jax.block_until_ready(out)

    ref = _reference(x, weight, bias)
    assert out.shape == (N, C, H, W)
    assert jnp.allclose(out, ref, atol=1e-4, rtol=1e-4), "mismatch vs pure-JAX reference"

    print("KERNEL_OK")
</pallas_src>

<mosaic_0001>
module attributes {stable_mosaic.version = 11 : i64} {
  func.func @_stats_kernel(%arg0: i32, %arg1: i32, %arg2: i32, %arg3: memref<2x4x256xf32, #tpu.memory_space<vmem>>, %arg4: memref<1x2x4xf32, #tpu.memory_space<vmem>>) attributes {dimension_semantics = [#tpu.dimension_semantics<parallel>, #tpu.dimension_semantics<arbitrary>, #tpu.dimension_semantics<arbitrary>], iteration_bounds = array<i64: 2, 1, 1>, scalar_prefetch = 0 : i64, scratch_operands = 0 : i64, tpu.core_type = #tpu.core_type<tc>, window_params = [{transform_indices = @transform_0, window_bounds = array<i64: 2, 4, 256>}, {transform_indices = @transform_1, window_bounds = array<i64: 1, 2, 4>}]} {
    %c0_i32 = arith.constant 0 : i32
    %0 = arith.cmpi eq, %arg1, %c0_i32 : i32
    %c0_i32_0 = arith.constant 0 : i32
    %1 = arith.cmpi eq, %arg2, %c0_i32_0 : i32
    %2 = arith.andi %0, %1 : i1
    %3 = arith.extui %2 : i1 to i32
    %c0_i32_1 = arith.constant 0 : i32
    %4 = arith.cmpi ne, %3, %c0_i32_1 : i32
    scf.if %4 {
      %cst_16 = arith.constant 0.000000e+00 : f32
      %17 = vector.broadcast %cst_16 : f32 to vector<1x2x4xf32>
      %c0_17 = arith.constant 0 : index
      %c0_18 = arith.constant 0 : index
      %c0_19 = arith.constant 0 : index
      %18 = vector.load %arg4[%c0_17, %c0_18, %c0_19] : memref<1x2x4xf32, #tpu.memory_space<vmem>>, vector<1x2x4xf32>
      tpu.vector_store %arg4[%c0_17, %c0_18, %c0_19], %17 {strides = array<i32>} : memref<1x2x4xf32, #tpu.memory_space<vmem>>, vector<1x2x4xf32>,
    } else {
    }
    %c0 = arith.constant 0 : index
    %c0_2 = arith.constant 0 : index
    %c0_3 = arith.constant 0 : index
    %5 = vector.load %arg3[%c0, %c0_2, %c0_3] : memref<2x4x256xf32, #tpu.memory_space<vmem>>, vector<2x4x256xf32>
    %cst = arith.constant dense<0.000000e+00> : vector<4xf32>
    %6 = vector.multi_reduction <add>, %5, %cst [0, 2] : vector<2x4x256xf32> to vector<4xf32>
    %7 = vector.shape_cast %6 : vector<4xf32> to vector<1x1x4xf32>
    %8 = arith.mulf %5, %5 : vector<2x4x256xf32>
    %cst_4 = arith.constant dense<0.000000e+00> : vector<4xf32>
    %9 = vector.multi_reduction <add>, %8, %cst_4 [0, 2] : vector<2x4x256xf32> to vector<4xf32>
    %10 = vector.shape_cast %9 : vector<4xf32> to vector<1x1x4xf32>
    %c0_5 = arith.constant 0 : index
    %c0_6 = arith.constant 0 : index
    %c0_7 = arith.constant 0 : index
    %11 = vector.load %arg4[%c0_5, %c0_6, %c0_7] : memref<1x2x4xf32, #tpu.memory_space<vmem>>, vector<1x1x4xf32>
    %12 = arith.addf %11, %7 : vector<1x1x4xf32>
    %c0_8 = arith.constant 0 : index
    %c0_9 = arith.constant 0 : index
    %c0_10 = arith.constant 0 : index
    %13 = vector.load %arg4[%c0_8, %c0_9, %c0_10] : memref<1x2x4xf32, #tpu.memory_space<vmem>>, vector<1x1x4xf32>
    tpu.vector_store %arg4[%c0_8, %c0_9, %c0_10], %12 {strides = array<i32>} : memref<1x2x4xf32, #tpu.memory_space<vmem>>, vector<1x1x4xf32>,
    %c0_11 = arith.constant 0 : index
    %c1 = arith.constant 1 : index
    %c0_12 = arith.constant 0 : index
    %14 = vector.load %arg4[%c0_11, %c1, %c0_12] : memref<1x2x4xf32, #tpu.memory_space<vmem>>, vector<1x1x4xf32>
    %15 = arith.addf %14, %10 : vector<1x1x4xf32>
    %c0_13 = arith.constant 0 : index
    %c1_14 = arith.constant 1 : index
    %c0_15 = arith.constant 0 : index
    %16 = vector.load %arg4[%c0_13, %c1_14, %c0_15] : memref<1x2x4xf32, #tpu.memory_space<vmem>>, vector<1x1x4xf32>
    tpu.vector_store %arg4[%c0_13, %c1_14, %c0_15], %15 {strides = array<i32>} : memref<1x2x4xf32, #tpu.memory_space<vmem>>, vector<1x1x4xf32>,
    return
  }
  func.func @transform_0(%arg0: i32, %arg1: i32, %arg2: i32) -> (i32, i32, i32) {
    %c1_i32 = arith.constant 1 : i32
    %0 = arith.muli %arg0, %c1_i32 : i32
    %1 = arith.addi %0, %arg1 : i32
    %c0_i32 = arith.constant 0 : i32
    %c0_i32_0 = arith.constant 0 : i32
    return %1, %c0_i32, %arg2 : i32, i32, i32
  }
  func.func @transform_1(%arg0: i32, %arg1: i32, %arg2: i32) -> (i32, i32, i32) {
    %c0_i32 = arith.constant 0 : i32
    %c0_i32_0 = arith.constant 0 : i32
    %c0_i32_1 = arith.constant 0 : i32
    return %arg0, %c0_i32, %c0_i32_0 : i32, i32, i32
  }
}

module attributes {stable_mosaic.version = 11 : i64} {
  func.func @_normalize_kernel(%arg0: i32, %arg1: i32, %arg2: i32, %arg3: memref<1x4x1xf32, #tpu.memory_space<vmem>>, %arg4: memref<1x4x1xf32, #tpu.memory_space<vmem>>, %arg5: memref<2x4x256xf32, #tpu.memory_space<vmem>>, %arg6: memref<2x4x256xf32, #tpu.memory_space<vmem>>) attributes {dimension_semantics = [#tpu.dimension_semantics<parallel>, #tpu.dimension_semantics<parallel>, #tpu.dimension_semantics<parallel>], iteration_bounds = array<i64: 2, 1, 1>, scalar_prefetch = 0 : i64, scratch_operands = 0 : i64, tpu.core_type = #tpu.core_type<tc>, window_params = [{transform_indices = @transform_0, window_bounds = array<i64: 1, 4, 1>}, {transform_indices = @transform_1, window_bounds = array<i64: 1, 4, 1>}, {transform_indices = @transform_2, window_bounds = array<i64: 2, 4, 256>}, {transform_indices = @transform_3, window_bounds = array<i64: 2, 4, 256>}]} {
    %c0 = arith.constant 0 : index
    %c0_0 = arith.constant 0 : index
    %c0_1 = arith.constant 0 : index
    %0 = vector.load %arg5[%c0, %c0_0, %c0_1] : memref<2x4x256xf32, #tpu.memory_space<vmem>>, vector<2x4x256xf32>
    %c0_2 = arith.constant 0 : index
    %c0_3 = arith.constant 0 : index
    %c0_4 = arith.constant 0 : index
    %1 = vector.load %arg3[%c0_2, %c0_3, %c0_4] : memref<1x4x1xf32, #tpu.memory_space<vmem>>, vector<1x4x1xf32>
    %c0_5 = arith.constant 0 : index
    %c0_6 = arith.constant 0 : index
    %c0_7 = arith.constant 0 : index
    %2 = vector.load %arg4[%c0_5, %c0_6, %c0_7] : memref<1x4x1xf32, #tpu.memory_space<vmem>>, vector<1x4x1xf32>
    %3 = vector.broadcast %1 : vector<1x4x1xf32> to vector<2x4x256xf32>
    %4 = arith.mulf %0, %3 : vector<2x4x256xf32>
    %5 = vector.broadcast %2 : vector<1x4x1xf32> to vector<2x4x256xf32>
    %6 = arith.addf %4, %5 : vector<2x4x256xf32>
    %c0_8 = arith.constant 0 : index
    %c0_9 = arith.constant 0 : index
    %c0_10 = arith.constant 0 : index
    %7 = vector.load %arg6[%c0_8, %c0_9, %c0_10] : memref<2x4x256xf32, #tpu.memory_space<vmem>>, vector<2x4x256xf32>
    tpu.vector_store %arg6[%c0_8, %c0_9, %c0_10], %6 {strides = array<i32>} : memref<2x4x256xf32, #tpu.memory_space<vmem>>, vector<2x4x256xf32>,
    return
  }
  func.func @transform_0(%arg0: i32, %arg1: i32, %arg2: i32) -> (i32, i32, i32) {
    %c0_i32 = arith.constant 0 : i32
    %c0_i32_0 = arith.constant 0 : i32
    %c0_i32_1 = arith.constant 0 : i32
    return %arg0, %c0_i32, %c0_i32_0 : i32, i32, i32
  }
  func.func @transform_1(%arg0: i32, %arg1: i32, %arg2: i32) -> (i32, i32, i32) {
    %c0_i32 = arith.constant 0 : i32
    %c0_i32_0 = arith.constant 0 : i32
    %c0_i32_1 = arith.constant 0 : i32
    return %arg0, %c0_i32, %c0_i32_0 : i32, i32, i32
  }
  func.func @transform_2(%arg0: i32, %arg1: i32, %arg2: i32) -> (i32, i32, i32) {
    %c1_i32 = arith.constant 1 : i32
    %0 = arith.muli %arg0, %c1_i32 : i32
    %1 = arith.addi %0, %arg1 : i32
    %c0_i32 = arith.constant 0 : i32
    %c0_i32_0 = arith.constant 0 : i32
    return %1, %c0_i32, %arg2 : i32, i32, i32
  }
  func.func @transform_3(%arg0: i32, %arg1: i32, %arg2: i32) -> (i32, i32, i32) {
    %c1_i32 = arith.constant 1 : i32
    %0 = arith.muli %arg0, %c1_i32 : i32
    %1 = arith.addi %0, %arg1 : i32
    %c0_i32 = arith.constant 0 : i32
    %c0_i32_0 = arith.constant 0 : i32
    return %1, %c0_i32, %arg2 : i32, i32, i32
  }
}

</mosaic_0001>

<bundles_post_ra>
// kernel: mul.0
= control target key start
LH: loop header
LB: loop body
LE: loop exit
PB: predicated region body
PF: predicated region fallthrough
CT: control target
= control target key end

     0   :  { %s34_s0 = inlined_call_operand.vmem [shape: f32[2,4,1], index: 0, kind: input, shape index: {}, may-alias: {0,1}]   ;;  %s35_s1 = inlined_call_operand.vmem [shape: f32[2,4,1], index: 1, kind: input, shape index: {}, may-alias: {0,1}]   ;;  %s36_s2 = inlined_call_operand.vmem [shape: f32[2,4,1], index: 2, kind: output, shape index: {}]  }
   0x1   :  { %v3_v0 = vld [vmem:[%s34_s0] sm:$0x3] }
   0x2   :  { %v4_v1 = vld [vmem:[%s35_s1] sm:$0x3] }
   0x3   :  { %v7_v2 = vmul.f32 %v4_v1, %v3_v0 }
   0x5   :  { %9 = vst [vmem:[%s36_s2] sm:$0x3] %v7_v2 }

// kernel: transnorm_forward.2
= control target key start
LH: loop header
LB: loop body
LE: loop exit
PB: predicated region body
PF: predicated region fallthrough
CT: control target
= control target key end

     0   :  { %s376_s6 = smov 0   ;;  %s378_s7 = smov 0   ;;  %s424_s0 = inlined_call_operand.vmem [shape: f32[4,4,256], index: 0, kind: input, shape index: {}]   ;;  %s425_s1 = inlined_call_operand.vmem [shape: f32[2,2,4], index: 1, kind: output, shape index: {}]  }
   0x1   :  { %s380_s8 = smov 0  }
   0x2 LB: > { %s30_s9 = sadd.s32 1, %s359_s7  ;;  %p308_p0 = scmp.ge.s32.totalorder %s363_s8, 1  ;;  %s363_s8 = sphi %s380_s8, %s11_s8   ;;  %s359_s7 = sphi %s378_s7, %s427_s7   ;;  %s355_s6 = sphi %s376_s6, %s426_s6  }
   0x3   : > { %p32_p1 = scmp.ge.s32.totalorder %s30_s9, 2  ;;  %p119_p2 = scmp.lt.s32.totalorder %s363_s8, 3 }
   0x5   : > { %s429_s9 = smov (%p32_p1, %s30_s9), 0  ;;  %p120_p3 = pnand %p308_p0, %p119_p2 }
   0x6   : > { %s309_s10 = sshll.u32 (!%p120_p3), %s355_s6, 1  ;;  %p158_p4 = scmp.lt.s32.totalorder (!%p120_p3), %s355_s6, 1 }
   0x7   : > { %123 = sbr.rel (%p120_p3) target bundleno = 162 (0xa2), region = 24  ;;  %p147_p5 = scmp.lt.s32.totalorder (!%p120_p3), %s309_s10, 3 }
   0xc   : > { %s431_s6 = smov (!%p158_p4, %s355_s6), 1  ;;  %s433_s10 = smov (!%p147_p5, %s309_s10), 3  ;;  %vm168_vm0 = vcmask 25600   ;;  %v365_v0 = vmov 0.0   ;;  %vm185_vm1 = vcmask 1043456   ;;  %v221_v27 = vlaneseq }
   0xd   : > { %s312_s11 = sshll.u32 %s431_s6, 1  ;;  %s315_s12 = sshll.u32 %s433_s10, 3  ;;  %vm226_vm2 = vcmask 24576  }
   0xe   : > { %s397_s15 = scalar_lea.vmem %s425_s1, %s312_s11  ;;  %s154_s18 = scalar_lea.vmem %s424_s0, %s315_s12  ;;  %v222_v28 = vand.u32 127, %v221_v27 }
   0xf   : > { %169 = vst.msk [vmem:[%s397_s15] sm:$0x3] %vm168_vm0, %v365_v0  ;;  %v170_v1 = vld [vmem:[%s154_s18] sm:$0xff]  ;;  %v171_v2 = vld [vmem:[%s154_s18 + $0x8] sm:$0xff] }
  0x10   : > { %174 = vst [vmem:[#allocation1] ss:$2 sm:$0xff] %v170_v1  ;;  %v195_v3 = vmul.f32 %v170_v1, %v170_v1  ;;  %v196_v4 = vmul.f32 %v171_v2, %v171_v2 }
  0x11   : > { %178 = vst [vmem:[#allocation1 + $0x10] ss:$2 sm:$0xff] %v171_v2 }
  0x16   : > { %v219_v29 = vld [vmem:[%s397_s15] sm:$0x1]  ;;  %v228_v33 = vld [vmem:[%s397_s15 + $0x1] sm:$0x1] }
  0x17   : > { %v175_v5 = vld.sshfl [vmem:[#allocation1] sm:$0xff pattern:$0x75316420]  ;;  %v176_v6 = vld.sshfl [vmem:[#allocation1 + $0x8] sm:$0xff pattern:$0x75316420] }
  0x18   : > { %v179_v7 = vld.sshfl [vmem:[#allocation1 + $0x10] sm:$0xff pattern:$0x75316420]  ;;  %v180_v8 = vld.sshfl [vmem:[#allocation1 + $0x18] sm:$0xff pattern:$0x75316420] }
  0x19   : > { %v186_v9 = vsel %vm185_vm1, %v175_v5, 0.0  ;;  %v187_v10 = vsel %vm185_vm1, %v176_v6, 0.0  ;;  %v189_v11 = vsel %vm185_vm1, %v179_v7, 0.0  ;;  %199 = vst [vmem:[#allocation1] ss:$2 sm:$0xff] %v195_v3  ;;  %v191_v13 = vsel %vm185_vm1, %v180_v8, 0.0 }
  0x1a   : > { %v188_v12 = vadd.f32 %v187_v10, %v186_v9  ;;  %203 = vst [vmem:[#allocation1 + $0x10] ss:$2 sm:$0xff] %v196_v4 }
  0x1c   : > { %v190_v14 = vadd.f32 %v189_v11, %v188_v12 }
  0x1e   : > { %v192_v15 = vadd.f32 %v191_v13, %v190_v14 }
  0x20   : > { %193 = vadd.xlane.f32.xlu0 %v192_v15  ;;  %v200_v16 = vld.sshfl [vmem:[#allocation1] sm:$0xff pattern:$0x75316420]  ;;  %v201_v17 = vld.sshfl [vmem:[#allocation1 + $0x8] sm:$0xff pattern:$0x75316420] }
  0x21   : > { %v204_v18 = vld.sshfl [vmem:[#allocation1 + $0x10] sm:$0xff pattern:$0x75316420]  ;;  %v205_v19 = vld.sshfl [vmem:[#allocation1 + $0x18] sm:$0xff pattern:$0x75316420] }
  0x22   : > { %v210_v20 = vsel %vm185_vm1, %v200_v16, 0.0  ;;  %v211_v21 = vsel %vm185_vm1, %v201_v17, 0.0  ;;  %v213_v22 = vsel %vm185_vm1, %v204_v18, 0.0  ;;  %v215_v24 = vsel %vm185_vm1, %v205_v19, 0.0 }
  0x23   : > { %v212_v23 = vadd.f32 %v211_v21, %v210_v20 }
  0x25   : > { %v214_v25 = vadd.f32 %v213_v22, %v212_v23 }
  0x27   : > { %v216_v26 = vadd.f32 %v215_v24, %v214_v25 }
  0x29   : > { %217 = vadd.xlane.f32.xlu0 %v216_v26 }
  0x93   : > { %v194_v30 = vpop.xlane.xlu0 %193 }
  0x94   : > { %v223_v31 = vperm.slane %v194_v30, %v222_v28 }
  0x96   : > { %v225_v32 = vadd.f32 %v223_v31, %v219_v29 }
  0x98   : > { %227 = vst.msk [vmem:[%s397_s15] sm:$0x1] %vm226_vm2, %v225_v32 }
  0x9c   : > { %v218_v34 = vpop.xlane.xlu0 %217 }
  0x9d   : > { %v230_v35 = vperm.slane %v218_v34, %v222_v28 }
  0x9f   : > { %v232_v36 = vadd.f32 %v230_v35, %v228_v33 }
  0xa1   : > { %233 = vst.msk [vmem:[%s397_s15 + $0x1] sm:$0x1] %vm226_vm2, %v232_v36 }
  0xa2 PF: > { %s11_s8 = sadd.s32 1, %s363_s8   ;;  %s426_s6 = smov %s359_s7 }
  0xa3   : > { %p8_p6 = scmp.ge.s32.totalorder %s11_s8, 4   ;;  %s427_s7 = smov %s429_s9 }
  0xa5   :  { %10 = sbr.rel (!%p8_p6) target bundleno = 2 (0x2), region = 60 }

// kernel: transnorm_forward.3
= control target key start
LH: loop header
LB: loop body
LE: loop exit
PB: predicated region body
PF: predicated region fallthrough
CT: control target
= control target key end

     0   :  { %s509_s12 = smov 0   ;;  %s511_s13 = smov 0   ;;  %s548_s0 = inlined_call_operand.vmem [shape: f32[2,4,1], index: 0, kind: input, shape index: {}]   ;;  %s549_s1 = inlined_call_operand.vmem [shape: f32[2,4,1], index: 1, kind: input, shape index: {}]   ;;  %s550_s2 = inlined_call_operand.vmem [shape: f32[4,4,256], index: 2, kind: input, shape index: {}]   ;;  %s551_s3 = inlined_call_operand.vmem [shape: f32[4,4,256], index: 3, kind: output, shape index: {}]  }
   0x1   :  { %s513_s14 = smov 0  }
   0x2 LB: > { %s32_s15 = sadd.s32 1, %s481_s13  ;;  %p423_p0 = scmp.ge.s32.totalorder %s485_s14, 1  ;;  %s485_s14 = sphi %s513_s14, %s13_s14   ;;  %s481_s13 = sphi %s511_s13, %s553_s13   ;;  %s477_s12 = sphi %s509_s12, %s552_s12  }
   0x3   : > { %p34_p1 = scmp.ge.s32.totalorder %s32_s15, 2  ;;  %p191_p2 = scmp.lt.s32.totalorder %s485_s14, 3 }
   0x5   : > { %s555_s15 = smov (%p34_p1, %s32_s15), 0  ;;  %p192_p3 = pnand %p423_p0, %p191_p2 }
   0x6   : > { %p235_p4 = scmp.lt.s32.totalorder (!%p192_p3), %s477_s12, 1  ;;  %s426_s24 = sshll.u32 (!%p192_p3), %s477_s12, 1 }
   0x7   : > { %195 = sbr.rel (%p192_p3) target bundleno = 146 (0x92), region = 32  ;;  %p246_p5 = scmp.lt.s32.totalorder (!%p192_p3), %s426_s24, 3 }
   0xc   : > { %v487_v0 = vmov 0   ;;  %s236_s16 = scalar_select %p235_p4, %s477_s12, 1  ;;  %v488_v3 = vmov 839922192  }
   0xd   : > { %462 = vset.pattern.permute.xlu0 %v487_v0  ;;  %s557_s24 = smov (!%p246_p5, %s426_s24), 3  ;;  %v280_v4 = vunpack.c.l.s4 %v488_v3 }
   0xe   : > { %s424_s17 = sshll.u32 %s236_s16, 2  ;;  %s434_s25 = sshll.u32 %s557_s24, 3 }
   0xf   : > { %s238_s20 = scalar_lea.vmem %s548_s0, %s424_s17  ;;  %s242_s23 = scalar_lea.vmem %s549_s1, %s424_s17  ;;  %v281_v6 = vunpack.c.0.s8 %v280_v4 }
  0x10   : > { %v273_v1 = vld [vmem:[%s238_s20] sm:$0xf]  ;;  %s253_s28 = scalar_lea.vmem %s550_s2, %s434_s25  ;;  %s267_s4 = scalar_lea.vmem %s551_s3, %s434_s25 }
  0x11   : > { %277 = vperm.xlu0 %462, %v273_v1   ;;  %v274_v2 = vld [vmem:[%s242_s23] sm:$0xf]  ;;  %v272_v9 = vld [vmem:[%s253_s28 + $0x8] sm:$0xff] }
  0x12   : > { %v271_v8 = vld [vmem:[%s253_s28] sm:$0xff] }
  0x19   : > { %288 = vperm.xlu0 %462, %v274_v2  }
  0x83   : > { %v278_v5 = vpop.permute.xlu0 %277 }
  0x84   : > { %v282_v7 = vperm.slane %v278_v5, %v281_v6 }
  0x86   : > { %v284_v11 = vmul.f32 %v282_v7, %v271_v8  ;;  %v285_v12 = vmul.f32 %v282_v7, %v272_v9 }
  0x8b   : > { %v289_v10 = vpop.permute.xlu0 %288 }
  0x8c   : > { %v293_v13 = vperm.slane %v289_v10, %v281_v6 }
  0x8e   : > { %v295_v14 = vadd.f32 %v293_v13, %v284_v11  ;;  %v296_v15 = vadd.f32 %v293_v13, %v285_v12 }
  0x90   : > { %297 = vst [vmem:[%s267_s4] sm:$0xff] %v295_v14 }
  0x91   : > { %298 = vst [vmem:[%s267_s4 + $0x8] sm:$0xff] %v296_v15 }
  0x92 PF: > { %s13_s14 = sadd.s32 1, %s485_s14   ;;  %s552_s12 = smov %s481_s13 }
  0x93   : > { %p10_p6 = scmp.ge.s32.totalorder %s13_s14, 4   ;;  %s553_s13 = smov %s555_s15 }
  0x95   :  { %12 = sbr.rel (!%p10_p6) target bundleno = 2 (0x2), region = 68 }

</bundles_post_ra>
